<compile_context>
chip_gen: v6e
topology: v6e:2x2x1
jax: 0.10.0
libtpu: 0.0.40
codegen_flags: <defaults>
</compile_context>

<pallas_src>
import numpy as np
import jax
import jax.numpy as jnp
from jax.experimental import pallas as pl
from jax.experimental.pallas import tpu as pltpu

LANE = 128      # hidden dim padded to a multiple of this (lane-dense activations)
SUBLANE = 8     # batch tiles must be a multiple of this


def _round_up(x, m):
    return ((x + m - 1) // m) * m


def _cdiv(a, b):
    return (a + b - 1) // b


def _make_mlp_kernel(n_layers):
    """Fused MLP: n_layers Linear layers, ReLU between all but the last.

    Kernel args: x_ref, (w_ref, b_ref) * n_layers, o_ref.
    Weights are bf16 (full-rate MXU operands); accumulate + bias + ReLU in f32
    (keeps the elementwise path f32 -- required shape for v5e's VPU).
    All intermediates stay in VMEM/vregs -- no HBM round-trips between layers.
    """
    def kernel(x_ref, *refs):
        o_ref = refs[-1]
        h = x_ref[...].astype(jnp.bfloat16)
        for li in range(n_layers):
            w = refs[2 * li][...]
            b = refs[2 * li + 1][...]
            acc = jnp.dot(h, w, preferred_element_type=jnp.float32) + b
            if li < n_layers - 1:
                h = jnp.maximum(acc, 0.0).astype(jnp.bfloat16)
            else:
                # Narrow (TB, out_d) store: masked vst in-kernel, but 16x fewer
                # HBM output bytes than a 128-lane-padded f32 tile.
                o_ref[...] = acc.astype(o_ref.dtype)
    return kernel


def prepare_params(params):
    """One-time parameter prep (do NOT call per forward).

    * cast weights to bf16, keep biases f32 (added after the f32 accumulate)
    * zero-pad the hidden dimension to a multiple of 128 so inter-layer
      activations / bias / ReLU are lane-dense.  Zero padding is exact:
      padded hidden units stay 0 through ReLU and contribute 0 downstream.
    * the final layer's output columns are left UNPADDED (narrow HBM writeback).
    """
    n = len(params)
    hidden = int(np.asarray(params[0][0]).shape[1])
    hidden_pad = _round_up(hidden, LANE)
    prepped = []
    for li, (w, b) in enumerate(params):
        w = jnp.asarray(w, jnp.float32)
        b = jnp.asarray(b, jnp.float32).reshape(1, -1)
        pad_rows = (hidden_pad - w.shape[0]) if li > 0 else 0
        pad_cols = (hidden_pad - w.shape[1]) if li < n - 1 else 0
        if pad_rows or pad_cols:
            w = jnp.pad(w, ((0, pad_rows), (0, pad_cols)))
        if pad_cols:
            b = jnp.pad(b, ((0, 0), (0, pad_cols)))
        prepped.append((w.astype(jnp.bfloat16), b.astype(jnp.float32)))
    return prepped


def small_encoder_1d(x, prepped_params, *, tb=2048, min_split_batch=1024):
    """x: (B, in_d) f32 or bf16. prepped_params: output of prepare_params().
    Returns (B, out_d) f32."""
    B, in_d = x.shape
    n_layers = len(prepped_params)
    out_d = prepped_params[-1][0].shape[1]

    # Balanced batch tiling: split B into n_tiles near-equal tiles (each a
    # multiple of 8 rows) instead of rounding B up to a fixed 512/2048 granule.
    # When B is large enough, force an even tile count so v7x's two TensorCores
    # both get real work (no-op on v5e/v6e which have 1 TC).
    n_tiles = _cdiv(B, tb)
    if B >= min_split_batch:
        n_tiles = max(n_tiles, 2)
        if n_tiles % 2:
            n_tiles += 1
    TB = _round_up(_cdiv(B, n_tiles), SUBLANE)
    B_pad = TB * n_tiles
    if B_pad != B:
        # Zero rows propagate bias values through the ReLUs; they are sliced
        # off below, so correctness is unaffected.
        x = jnp.pad(x, ((0, B_pad - B), (0, 0)))

    grid = (n_tiles,)

    # x / out tiles stream over the batch (double-buffered pipeline); weights +
    # biases use a constant index_map so they stay VMEM-resident and are DMA'd
    # only once across all grid steps.
    in_specs = [pl.BlockSpec((TB, in_d), lambda i: (i, 0))]
    flat = []
    for (w, b) in prepped_params:
        in_specs.append(pl.BlockSpec(w.shape, lambda i: (0, 0)))
        in_specs.append(pl.BlockSpec(b.shape, lambda i: (0, 0)))
        flat.extend([w, b])
    out_specs = pl.BlockSpec((TB, out_d), lambda i: (i, 0))

    flops = 2 * B_pad * sum(int(w.shape[0]) * int(w.shape[1])
                            for w, _ in prepped_params)
    bytes_accessed = (int(x.size) * x.dtype.itemsize
                      + sum(int(a.size) * a.dtype.itemsize for a in flat)
                      + B_pad * out_d * 4)
    cost = pl.CostEstimate(flops=int(flops), transcendentals=0,
                           bytes_accessed=int(bytes_accessed))

    y_pad = pl.pallas_call(
        _make_mlp_kernel(n_layers),
        out_shape=jax.ShapeDtypeStruct((B_pad, out_d), jnp.float32),
        grid=grid,
        in_specs=in_specs,
        out_specs=out_specs,
        compiler_params=pltpu.CompilerParams(
            dimension_semantics=("parallel",),     # batch axis shards across v7x's 2 TCs
            vmem_limit_bytes=32 * 1024 * 1024,     # explicit; safe on v7x's 64 MiB VMEM
        ),
        cost_estimate=cost,
    )(x, *flat)

    return y_pad[:B]


def init_params(key, in_d, out_d, num_hidden=3):
    """PyTorch-Linear-style init: U(-1/sqrt(fan_in), 1/sqrt(fan_in)).
    Returns list of (W stored as (in, out), bias (1, out)) in f32."""
    hidden = 3 * in_d
    dims = [(in_d, hidden)]
    for _ in range(num_hidden - 1):
        dims.append((hidden, hidden))
    dims.append((hidden, out_d))

    params = []
    for fan_in, fan_out in dims:
        key, kw, kb = jax.random.split(key, 3)
        bound = 1.0 / np.sqrt(fan_in)
        w = jax.random.uniform(kw, (fan_in, fan_out), jnp.float32,
                               minval=-bound, maxval=bound)
        b = jax.random.uniform(kb, (1, fan_out), jnp.float32,
                               minval=-bound, maxval=bound)
        params.append((w, b))
    return params


def reference_forward(x, prepped_params):
    """Pure-JAX reference mirroring the kernel numerics (bf16 operands, f32 accum)."""
    h = x.astype(jnp.bfloat16)
    n = len(prepped_params)
    for li, (w, b) in enumerate(prepped_params):
        acc = jnp.dot(h, w, preferred_element_type=jnp.float32) + b
        if li < n - 1:
            h = jnp.maximum(acc, 0.0).astype(jnp.bfloat16)
        else:
            h = acc
    return h


if __name__ == "__main__":
    # TODO(synk): results match a bf16-operand / f32-accumulate reference (rtol~1e-2),
    # not a strict f32 PyTorch forward.
    key = jax.random.PRNGKey(0)
    B, in_d, out_d = 8, 16, 8          # hidden_dim = 3 * in_d = 48 (padded to 128)
    k_x, k_p, k_x2, k_x3 = jax.random.split(key, 4)

    params = init_params(k_p, in_d, out_d, num_hidden=3)
    prepped = prepare_params(params)   # bf16 weights, hidden dim lane-padded, done once

    # Small, spec-sized case (single balanced tile, grid=(1,)).
    x = jax.random.normal(k_x, (B, in_d), jnp.float32)
    y = jax.block_until_ready(small_encoder_1d(x, prepped))
    y_ref = reference_forward(x, prepped)
    assert y.shape == (B, out_d)
    np.testing.assert_allclose(np.asarray(y), np.asarray(y_ref),
                               rtol=1e-2, atol=1e-2)

    # Ragged medium batch: balanced tiling -> no padding rows at all for B=600.
    B2 = 600
    x2 = jax.random.normal(k_x2, (B2, in_d), jnp.float32)
    y2 = jax.block_until_ready(small_encoder_1d(x2, prepped))
    y2_ref = reference_forward(x2, prepped)
    assert y2.shape == (B2, out_d)
    np.testing.assert_allclose(np.asarray(y2), np.asarray(y2_ref),
                               rtol=1e-2, atol=1e-2)

    # Larger ragged batch exercising the multi-tile (dual-TC) + row-padding path.
    B3 = 1203
    x3 = jax.random.normal(k_x3, (B3, in_d), jnp.float32)
    y3 = jax.block_until_ready(small_encoder_1d(x3, prepped))
    y3_ref = reference_forward(x3, prepped)
    assert y3.shape == (B3, out_d)
    np.testing.assert_allclose(np.asarray(y3), np.asarray(y3_ref),
                               rtol=1e-2, atol=1e-2)

    print("KERNEL_OK")
</pallas_src>

<mosaic_0001>
module attributes {stable_mosaic.version = 11 : i64} {
  func.func @kernel(%arg0: i32, %arg1: memref<8x16xf32, #tpu.memory_space<vmem>>, %arg2: memref<16x128xbf16, #tpu.memory_space<vmem>>, %arg3: memref<1x128xf32, #tpu.memory_space<vmem>>, %arg4: memref<128x128xbf16, #tpu.memory_space<vmem>>, %arg5: memref<1x128xf32, #tpu.memory_space<vmem>>, %arg6: memref<128x128xbf16, #tpu.memory_space<vmem>>, %arg7: memref<1x128xf32, #tpu.memory_space<vmem>>, %arg8: memref<128x8xbf16, #tpu.memory_space<vmem>>, %arg9: memref<1x8xf32, #tpu.memory_space<vmem>>, %arg10: memref<8x8xf32, #tpu.memory_space<vmem>>) attributes {dimension_semantics = [#tpu.dimension_semantics<parallel>], iteration_bounds = array<i64: 1>, scalar_prefetch = 0 : i64, scratch_operands = 0 : i64, tpu.core_type = #tpu.core_type<tc>, window_params = [{transform_indices = @transform_0, window_bounds = array<i64: 8, 16>}, {pipeline_mode = #tpu.pipeline_mode<synchronous>, transform_indices = @transform_1, window_bounds = array<i64: 16, 128>}, {pipeline_mode = #tpu.pipeline_mode<synchronous>, transform_indices = @transform_2, window_bounds = array<i64: 1, 128>}, {pipeline_mode = #tpu.pipeline_mode<synchronous>, transform_indices = @transform_3, window_bounds = array<i64: 128, 128>}, {pipeline_mode = #tpu.pipeline_mode<synchronous>, transform_indices = @transform_4, window_bounds = array<i64: 1, 128>}, {pipeline_mode = #tpu.pipeline_mode<synchronous>, transform_indices = @transform_5, window_bounds = array<i64: 128, 128>}, {pipeline_mode = #tpu.pipeline_mode<synchronous>, transform_indices = @transform_6, window_bounds = array<i64: 1, 128>}, {pipeline_mode = #tpu.pipeline_mode<synchronous>, transform_indices = @transform_7, window_bounds = array<i64: 128, 8>}, {pipeline_mode = #tpu.pipeline_mode<synchronous>, transform_indices = @transform_8, window_bounds = array<i64: 1, 8>}, {transform_indices = @transform_9, window_bounds = array<i64: 8, 8>}]} {
    %c0 = arith.constant 0 : index
    %c0_0 = arith.constant 0 : index
    %0 = vector.load %arg1[%c0, %c0_0] : memref<8x16xf32, #tpu.memory_space<vmem>>, vector<8x16xf32>
    %1 = arith.truncf %0 : vector<8x16xf32> to vector<8x16xbf16>
    %c0_1 = arith.constant 0 : index
    %c0_2 = arith.constant 0 : index
    %2 = vector.load %arg2[%c0_1, %c0_2] : memref<16x128xbf16, #tpu.memory_space<vmem>>, vector<16x128xbf16>
    %c0_3 = arith.constant 0 : index
    %c0_4 = arith.constant 0 : index
    %3 = vector.load %arg3[%c0_3, %c0_4] : memref<1x128xf32, #tpu.memory_space<vmem>>, vector<1x128xf32>
    %cst = arith.constant dense<0.000000e+00> : vector<8x128xf32>
    %4 = tpu.matmul %1, %2, %cst {dimension_numbers = #tpu.dot_dimension_numbers<[1], [0], [0], [1], [0, 0, 1, 1], [], []>} : vector<8x16xbf16>, vector<16x128xbf16>, vector<8x128xf32> -> vector<8x128xf32>
    %5 = vector.broadcast %3 : vector<1x128xf32> to vector<8x128xf32>
    %6 = arith.addf %4, %5 : vector<8x128xf32>
    %cst_5 = arith.constant 0.000000e+00 : f32
    %7 = vector.broadcast %cst_5 : f32 to vector<8x128xf32>
    %8 = arith.maximumf %6, %7 : vector<8x128xf32>
    %9 = arith.truncf %8 : vector<8x128xf32> to vector<8x128xbf16>
    %c0_6 = arith.constant 0 : index
    %c0_7 = arith.constant 0 : index
    %10 = vector.load %arg4[%c0_6, %c0_7] : memref<128x128xbf16, #tpu.memory_space<vmem>>, vector<128x128xbf16>
    %c0_8 = arith.constant 0 : index
    %c0_9 = arith.constant 0 : index
    %11 = vector.load %arg5[%c0_8, %c0_9] : memref<1x128xf32, #tpu.memory_space<vmem>>, vector<1x128xf32>
    %cst_10 = arith.constant dense<0.000000e+00> : vector<8x128xf32>
    %12 = tpu.matmul %9, %10, %cst_10 {dimension_numbers = #tpu.dot_dimension_numbers<[1], [0], [0], [1], [0, 0, 1, 1], [], []>} : vector<8x128xbf16>, vector<128x128xbf16>, vector<8x128xf32> -> vector<8x128xf32>
    %13 = vector.broadcast %11 : vector<1x128xf32> to vector<8x128xf32>
    %14 = arith.addf %12, %13 : vector<8x128xf32>
    %cst_11 = arith.constant 0.000000e+00 : f32
    %15 = vector.broadcast %cst_11 : f32 to vector<8x128xf32>
    %16 = arith.maximumf %14, %15 : vector<8x128xf32>
    %17 = arith.truncf %16 : vector<8x128xf32> to vector<8x128xbf16>
    %c0_12 = arith.constant 0 : index
    %c0_13 = arith.constant 0 : index
    %18 = vector.load %arg6[%c0_12, %c0_13] : memref<128x128xbf16, #tpu.memory_space<vmem>>, vector<128x128xbf16>
    %c0_14 = arith.constant 0 : index
    %c0_15 = arith.constant 0 : index
    %19 = vector.load %arg7[%c0_14, %c0_15] : memref<1x128xf32, #tpu.memory_space<vmem>>, vector<1x128xf32>
    %cst_16 = arith.constant dense<0.000000e+00> : vector<8x128xf32>
    %20 = tpu.matmul %17, %18, %cst_16 {dimension_numbers = #tpu.dot_dimension_numbers<[1], [0], [0], [1], [0, 0, 1, 1], [], []>} : vector<8x128xbf16>, vector<128x128xbf16>, vector<8x128xf32> -> vector<8x128xf32>
    %21 = vector.broadcast %19 : vector<1x128xf32> to vector<8x128xf32>
    %22 = arith.addf %20, %21 : vector<8x128xf32>
    %cst_17 = arith.constant 0.000000e+00 : f32
    %23 = vector.broadcast %cst_17 : f32 to vector<8x128xf32>
    %24 = arith.maximumf %22, %23 : vector<8x128xf32>
    %25 = arith.truncf %24 : vector<8x128xf32> to vector<8x128xbf16>
    %c0_18 = arith.constant 0 : index
    %c0_19 = arith.constant 0 : index
    %26 = vector.load %arg8[%c0_18, %c0_19] : memref<128x8xbf16, #tpu.memory_space<vmem>>, vector<128x8xbf16>
    %c0_20 = arith.constant 0 : index
    %c0_21 = arith.constant 0 : index
    %27 = vector.load %arg9[%c0_20, %c0_21] : memref<1x8xf32, #tpu.memory_space<vmem>>, vector<1x8xf32>
    %cst_22 = arith.constant dense<0.000000e+00> : vector<8x8xf32>
    %28 = tpu.matmul %25, %26, %cst_22 {dimension_numbers = #tpu.dot_dimension_numbers<[1], [0], [0], [1], [0, 0, 1, 1], [], []>} : vector<8x128xbf16>, vector<128x8xbf16>, vector<8x8xf32> -> vector<8x8xf32>
    %29 = vector.broadcast %27 : vector<1x8xf32> to vector<8x8xf32>
    %30 = arith.addf %28, %29 : vector<8x8xf32>
    %c0_23 = arith.constant 0 : index
    %c0_24 = arith.constant 0 : index
    %31 = vector.load %arg10[%c0_23, %c0_24] : memref<8x8xf32, #tpu.memory_space<vmem>>, vector<8x8xf32>
    tpu.vector_store %arg10[%c0_23, %c0_24], %30 {strides = array<i32>} : memref<8x8xf32, #tpu.memory_space<vmem>>, vector<8x8xf32>,
    return
  }
  func.func @transform_0(%arg0: i32) -> (i32, i32) {
    %c0_i32 = arith.constant 0 : i32
    %c0_i32_0 = arith.constant 0 : i32
    return %arg0, %c0_i32 : i32, i32
  }
  func.func @transform_1(%arg0: i32) -> (i32, i32) {
    %c0_i32 = arith.constant 0 : i32
    %c0_i32_0 = arith.constant 0 : i32
    %c0_i32_1 = arith.constant 0 : i32
    return %c0_i32, %c0_i32_0 : i32, i32
  }
  func.func @transform_2(%arg0: i32) -> (i32, i32) {
    %c0_i32 = arith.constant 0 : i32
    %c0_i32_0 = arith.constant 0 : i32
    %c0_i32_1 = arith.constant 0 : i32
    return %c0_i32, %c0_i32_0 : i32, i32
  }
  func.func @transform_3(%arg0: i32) -> (i32, i32) {
    %c0_i32 = arith.constant 0 : i32
    %c0_i32_0 = arith.constant 0 : i32
    %c0_i32_1 = arith.constant 0 : i32
    return %c0_i32, %c0_i32_0 : i32, i32
  }
  func.func @transform_4(%arg0: i32) -> (i32, i32) {
    %c0_i32 = arith.constant 0 : i32
    %c0_i32_0 = arith.constant 0 : i32
    %c0_i32_1 = arith.constant 0 : i32
    return %c0_i32, %c0_i32_0 : i32, i32
  }
  func.func @transform_5(%arg0: i32) -> (i32, i32) {
    %c0_i32 = arith.constant 0 : i32
    %c0_i32_0 = arith.constant 0 : i32
    %c0_i32_1 = arith.constant 0 : i32
    return %c0_i32, %c0_i32_0 : i32, i32
  }
  func.func @transform_6(%arg0: i32) -> (i32, i32) {
    %c0_i32 = arith.constant 0 : i32
    %c0_i32_0 = arith.constant 0 : i32
    %c0_i32_1 = arith.constant 0 : i32
    return %c0_i32, %c0_i32_0 : i32, i32
  }
  func.func @transform_7(%arg0: i32) -> (i32, i32) {
    %c0_i32 = arith.constant 0 : i32
    %c0_i32_0 = arith.constant 0 : i32
    %c0_i32_1 = arith.constant 0 : i32
    return %c0_i32, %c0_i32_0 : i32, i32
  }
  func.func @transform_8(%arg0: i32) -> (i32, i32) {
    %c0_i32 = arith.constant 0 : i32
    %c0_i32_0 = arith.constant 0 : i32
    %c0_i32_1 = arith.constant 0 : i32
    return %c0_i32, %c0_i32_0 : i32, i32
  }
  func.func @transform_9(%arg0: i32) -> (i32, i32) {
    %c0_i32 = arith.constant 0 : i32
    %c0_i32_0 = arith.constant 0 : i32
    return %arg0, %c0_i32 : i32, i32
  }
}

</mosaic_0001>

<bundles_post_ra>
// kernel: tpu_custom_call.1
= control target key start
LH: loop header
LB: loop body
LE: loop exit
PB: predicated region body
PF: predicated region fallthrough
CT: control target
= control target key end

     0   :  { %14 = vsyncpa [#allocation3], 0  ;;  %s898_s0 = inlined_call_operand.vmem [shape: f32[8,16], index: 0, kind: input, shape index: {}]   ;;  %s899_s1 = inlined_call_operand.hbm [shape: bf16[16,128], index: 1, kind: input, shape index: {}]   ;;  %s900_s2 = inlined_call_operand.vmem [shape: f32[1,128], index: 2, kind: input, shape index: {}]   ;;  %s901_s3 = inlined_call_operand.vmem [shape: bf16[128,128], index: 3, kind: input, shape index: {}]   ;;  %s902_s4 = inlined_call_operand.hbm [shape: f32[1,128], index: 4, kind: input, shape index: {}]   ;;  %s903_s5 = inlined_call_operand.hbm [shape: bf16[128,128], index: 5, kind: input, shape index: {}]   ;;  %s904_s6 = inlined_call_operand.vmem [shape: f32[1,128], index: 6, kind: input, shape index: {}]   ;;  %s905_s7 = inlined_call_operand.vmem [shape: bf16[128,8], index: 7, kind: input, shape index: {}]   ;;  %s906_s8 = inlined_call_operand.vmem [shape: f32[1,8], index: 8, kind: input, shape index: {}]   ;;  %s907_s9 = inlined_call_operand.hbm [shape: f32[8,8], index: 9, kind: output, shape index: {}]  }
   0x1   :  { %15 = vsyncpa [#allocation6], 0 }
   0x2   :  { %16 = vsyncpa [#allocation4], 0  ;;  %s735_s30 = smov [#allocation5]   ;;  %s736_s11 = smov [#allocation2]  }
   0x3   :  { %s41_s10 = sshll.u32 %s735_s30, 4  ;;  %s24_s12 = sshll.u32 %s736_s11, 4  ;;  %s42_s10 = int_to_ptr.vmem [resolvable:$true] %s41_s10  ;;  %s25_s12 = int_to_ptr.vmem [resolvable:$true] %s24_s12 }
   0x4   :  { %s657_s13 = scalar_lea.vmem %s42_s10, 16  ;;  %s661_s14 = scalar_lea.vmem %s42_s10, 32 }
   0x5   :  { %p658_p0 = scmp.ne.s32.totalorder %s42_s10, %s657_s13  ;;  %p662_p1 = scmp.lt.s32.totalorder %s42_s10, %s42_s10 }
   0x6   :  { %p663_p2 = scmp.lt.s32.totalorder %s661_s14, %s657_s13 }
   0x8   :  { %p664_p3 = por %p663_p2, %p662_p1 }
   0xa   :  { %p665_p4 = pnand %p664_p3, %p658_p0 }
   0xc   :  { %668 = shalt.err (!%p665_p4)
}
   0xd   :  { %44 = dma.hbm_to_vmem [thread:$0]  %s902_s4, 16, %s42_s10, [#allocation6]  }
   0xe   :  { %s677_s17 = scalar_lea.vmem %s25_s12, 128  ;;  %p682_p6 = scmp.lt.s32.totalorder %s25_s12, %s25_s12 }
   0xf   :  { %p678_p5 = scmp.ne.s32.totalorder %s25_s12, %s677_s17  ;;  %p683_p7 = scmp.lt.s32.totalorder %s677_s17, %s677_s17 }
  0x11   :  { %p684_p8 = por %p683_p7, %p682_p6 }
  0x13   :  { %p685_p9 = pnand %p684_p8, %p678_p5 }
  0x15   :  { %688 = shalt.err (!%p685_p9)
}
  0x16   :  { %s737_s18 = smov 64   ;;  %s738_s19 = smov 4  }
  0x17   :  { %30 = dma.hbm_to_vmem [thread:$0]  %s899_s1, 128, %s25_s12, [#allocation3], %s737_s18, %s737_s18, %s738_s19  }
  0x18   :  { %s739_s22 = smov [#allocation7]  }
  0x19   :  { %s50_s23 = sshll.u32 %s739_s22, 4  ;;  %s51_s23 = int_to_ptr.vmem [resolvable:$true] %s50_s23 }
  0x1a   :  { %s697_s24 = scalar_lea.vmem %s51_s23, 1024  ;;  %p702_p11 = scmp.lt.s32.totalorder %s51_s23, %s51_s23 }
  0x1b   :  { %p698_p10 = scmp.ne.s32.totalorder %s51_s23, %s697_s24  ;;  %p703_p12 = scmp.lt.s32.totalorder %s697_s24, %s697_s24 }
  0x1d   :  { %p704_p13 = por %p703_p12, %p702_p11 }
  0x1f   :  { %p705_p0 = pnand %p704_p13, %p698_p10 }
  0x21   :  { %708 = shalt.err (!%p705_p0)
}
  0x22   :  { %56 = dma.hbm_to_vmem [thread:$0]  %s903_s5, 1024, %s51_s23, [#allocation6], %s737_s18, %s737_s18, %s738_s19  }
  0x23   :  { %729 = dma.done.wait [#allocation3], 128  }
  0x24   :  { %730 = vsyncadd [#allocation3], 4294967168 }
  0x25   :  { %731 = dma.done.wait [#allocation6], 1040  }
  0x26   :  { %732 = vsyncadd [#allocation6], 4294966256  ;;  %v740_v0 = vmov 0.0   ;;  %vm741_vm0 = vmmov 0   ;;  %v624_v1 = vld [vmem:[#allocation2] sm:$0xff]   ;;  %vm90_vm1 = vcmask 130048  }
  0x27   :  { %550 = vmatprep.subr.bf16.mxu0 %v740_v0  ;;  %552 = vmatprep.mubr.msk.bf16.mxu0 %vm741_vm0, %v740_v0  ;;  %v73_v2 = vld [vmem:[%s898_s0] sm:$0xff]  ;;  %v625_v4 = vld [vmem:[%s901_s3 + $0x38] sm:$0xff]   ;;  %v626_v5 = vld [vmem:[%s901_s3 + $0x30] sm:$0xff]   ;;  %s742_s15 = smov [#allocation8]   ;;  %vm473_vm2 = vcmask 64512  }
  0x28   :  { %556 = vmatprep.subr.bf16.mxu1 %v740_v0  ;;  %572 = vmatprep.mubr.msk.bf16.mxu1 %vm741_vm0, %v740_v0  ;;  %v74_v3 = vpack.c.bf16 %v73_v2, %v73_v2  ;;  %v627_v6 = vld [vmem:[%s901_s3 + $0x28] sm:$0xff]   ;;  %v628_v7 = vld [vmem:[%s901_s3 + $0x20] sm:$0xff]   ;;  %v629_v8 = vld [vmem:[%s901_s3 + $0x18] sm:$0xff]   ;;  %s481_s16 = sshll.u32 %s742_s15, 4  ;;  %s482_s16 = int_to_ptr.vmem [resolvable:$true] %s481_s16 }
  0x29   :  { %551 = vmatpush3.bf16.msra.mxu0 %v624_v1  ;;  %557 = vmatpush3.bf16.msra.mxu1 %v625_v4  ;;  %v630_v9 = vld [vmem:[%s901_s3 + $0x10] sm:$0xff]   ;;  %v631_v10 = vld [vmem:[%s901_s3 + $0x8] sm:$0xff]   ;;  %v632_v11 = vld [vmem:[%s901_s3] sm:$0xff]   ;;  %p714_p2 = scmp.lt.s32.totalorder %s482_s16, %s482_s16 }
  0x2a   :  { %576 = vmatprep.subr.bf16.mxu0 %v740_v0  ;;  %558 = vmatprep.subr.bf16.mxu1 %v740_v0  ;;  %v633_v12 = vld [vmem:[#allocation7 + $0x38] sm:$0xff]   ;;  %v634_v13 = vld [vmem:[#allocation7 + $0x30] sm:$0xff]   ;;  %v635_v14 = vld [vmem:[#allocation7 + $0x28] sm:$0xff]  }
  0x2b   :  { %v636_v15 = vld [vmem:[#allocation7 + $0x20] sm:$0xff]   ;;  %v637_v16 = vld [vmem:[#allocation7 + $0x18] sm:$0xff]   ;;  %v638_v17 = vld [vmem:[#allocation7 + $0x10] sm:$0xff]  }
  0x2c   :  { %553 = vmatmul.mubr.msk.bf16.vlgmr.msra.gmra.mxu0 %vm90_vm1, %v74_v3  ;;  %v491_v18 = vld [vmem:[%s900_s2] ss:$0 sm:$0xff]  ;;  %v639_v26 = vld [vmem:[#allocation7 + $0x8] sm:$0xff]   ;;  %v640_v27 = vld [vmem:[#allocation7] sm:$0xff]  }
  0x2d   :  { %592 = vmatprep.mubr.msk.bf16.mxu0 %vm741_vm0, %v740_v0  ;;  %559 = vmatpush3.bf16.msra.mxu1 %v626_v5  ;;  %v641_v28 = vld [vmem:[%s905_s7 + $0x38] sm:$0xff]   ;;  %v642_v29 = vld [vmem:[%s905_s7 + $0x30] sm:$0xff]   ;;  %v643_v30 = vld [vmem:[%s905_s7 + $0x28] sm:$0xff]  }
  0x2e   :  { %560 = vmatprep.subr.bf16.mxu1 %v740_v0  ;;  %577 = vmatpush3.bf16.msra.mxu0 %v633_v12  ;;  %v644_v31 = vld [vmem:[%s905_s7 + $0x20] sm:$0xff]   ;;  %v645_v32 = vld [vmem:[%s905_s7 + $0x18] sm:$0xff]   ;;  %v646_v33 = vld [vmem:[%s905_s7 + $0x10] sm:$0xff]  }
  0x2f   :  { %578 = vmatprep.subr.bf16.mxu0 %v740_v0  ;;  %v494_v34 = vld [vmem:[#allocation5] ss:$0 sm:$0xff]  ;;  %v648_v43 = vld [vmem:[%s905_s7] sm:$0xff]  }
  0x30   :  { %v647_v42 = vld [vmem:[%s905_s7 + $0x8] sm:$0xff]   ;;  %v503_v44 = vld [vmem:[%s904_s6] ss:$0 sm:$0xff]  ;;  %s709_s6 = scalar_lea.vmem %s482_s16, 128 }
  0x31   :  { %561 = vmatpush3.bf16.msra.mxu1 %v627_v6  ;;  %v512_v52 = vld [vmem:[%s906_s8] ss:$0 sm:$0xff]  ;;  %p710_p1 = scmp.ne.s32.totalorder %s482_s16, %s709_s6  ;;  %p715_p3 = scmp.lt.s32.totalorder %s709_s6, %s709_s6 }
  0x32   :  { %562 = vmatprep.subr.bf16.mxu1 %v740_v0  ;;  %579 = vmatpush3.bf16.msra.mxu0 %v634_v13 }
  0x33   :  { %580 = vmatprep.subr.bf16.mxu0 %v740_v0  ;;  %p716_p4 = por %p715_p3, %p714_p2 }
  0x35   :  { %563 = vmatpush3.bf16.msra.mxu1 %v628_v7  ;;  %p717_p5 = pnand %p716_p4, %p710_p1 }
  0x36   :  { %564 = vmatprep.subr.bf16.mxu1 %v740_v0  ;;  %581 = vmatpush3.bf16.msra.mxu0 %v635_v14 }
  0x37   :  { %582 = vmatprep.subr.bf16.mxu0 %v740_v0 }
  0x39   :  { %565 = vmatpush3.bf16.msra.mxu1 %v629_v8 }
  0x3a   :  { %566 = vmatprep.subr.bf16.mxu1 %v740_v0  ;;  %583 = vmatpush3.bf16.msra.mxu0 %v636_v15 }
  0x3b   :  { %584 = vmatprep.subr.bf16.mxu0 %v740_v0 }
  0x3d   :  { %567 = vmatpush3.bf16.msra.mxu1 %v630_v9 }
  0x3e   :  { %568 = vmatprep.subr.bf16.mxu1 %v740_v0  ;;  %585 = vmatpush3.bf16.msra.mxu0 %v637_v16 }
  0x3f   :  { %586 = vmatprep.subr.bf16.mxu0 %v740_v0 }
  0x41   :  { %569 = vmatpush3.bf16.msra.mxu1 %v631_v10 }
  0x42   :  { %570 = vmatprep.subr.bf16.mxu1 %v740_v0  ;;  %587 = vmatpush3.bf16.msra.mxu0 %v638_v17 }
  0x43   :  { %588 = vmatprep.subr.bf16.mxu0 %v740_v0 }
  0x45   :  { %571 = vmatpush3.bf16.msra.mxu1 %v632_v11 }
  0x46   :  { %596 = vmatprep.subr.bf16.mxu1 %v740_v0  ;;  %589 = vmatpush3.bf16.msra.mxu0 %v639_v26 }
  0x47   :  { %590 = vmatprep.subr.bf16.mxu0 %v740_v0 }
  0x4a   :  { %591 = vmatpush3.bf16.msra.mxu0 %v640_v27 }
  0xec   :  { %v128_v19 = vpop.f32.mrf.mxu0 }
  0xed   :  { %v129_v20 = vadd.f32 %v491_v18, %v128_v19 }
  0xee   :  { %v554_v21 = vpop.f32.mrf.mxu0 }
  0xef   :  { %v134_v22 = vmax.f32 %v129_v20, 0.0 }
  0xf0   :  { %v131_v23 = vpop.f32.mrf.mxu0 }
  0xf1   :  { %v135_v24 = vpack.c.bf16 %v134_v22, %v134_v22 }
  0xf2   :  { %v555_v25 = vpop.f32.mrf.mxu0 }
  0xf3   :  { %573 = vmatmul.mubr.bf16.vlgmr.msra.gmra.mxu1 %v135_v24 }
  0xf4   :  { %612 = vmatprep.mubr.msk.bf16.mxu1 %vm741_vm0, %v740_v0  ;;  %597 = vmatpush3.bf16.msra.mxu1 %v641_v28 }
  0xf5   :  { %598 = vmatprep.subr.bf16.mxu1 %v740_v0 }
  0xf8   :  { %599 = vmatpush3.bf16.msra.mxu1 %v642_v29 }
  0xf9   :  { %600 = vmatprep.subr.bf16.mxu1 %v740_v0 }
  0xfc   :  { %601 = vmatpush3.bf16.msra.mxu1 %v643_v30 }
  0xfd   :  { %602 = vmatprep.subr.bf16.mxu1 %v740_v0 }
 0x100   :  { %603 = vmatpush3.bf16.msra.mxu1 %v644_v31 }
 0x101   :  { %604 = vmatprep.subr.bf16.mxu1 %v740_v0 }
 0x104   :  { %605 = vmatpush3.bf16.msra.mxu1 %v645_v32 }
 0x105   :  { %606 = vmatprep.subr.bf16.mxu1 %v740_v0 }
 0x108   :  { %607 = vmatpush3.bf16.msra.mxu1 %v646_v33 }
 0x109   :  { %608 = vmatprep.subr.bf16.mxu1 %v740_v0 }
 0x10c   :  { %609 = vmatpush3.bf16.msra.mxu1 %v647_v42 }
 0x10d   :  { %610 = vmatprep.subr.bf16.mxu1 %v740_v0 }
 0x110   :  { %611 = vmatpush3.bf16.msra.mxu1 %v648_v43 }
 0x1b3   :  { %v241_v35 = vpop.f32.mrf.mxu1 }
 0x1b4   :  { %v242_v36 = vadd.f32 %v494_v34, %v241_v35 }
 0x1b5   :  { %v574_v37 = vpop.f32.mrf.mxu1 }
 0x1b6   :  { %v247_v38 = vmax.f32 %v242_v36, 0.0 }
 0x1b7   :  { %v244_v39 = vpop.f32.mrf.mxu1 }
 0x1b8   :  { %v248_v40 = vpack.c.bf16 %v247_v38, %v247_v38 }
 0x1b9   :  { %v575_v41 = vpop.f32.mrf.mxu1 }
 0x1ba   :  { %593 = vmatmul.mubr.bf16.vlgmr.msra.gmra.mxu0 %v248_v40 }
 0x27a   :  { %v354_v45 = vpop.f32.mrf.mxu0 }
 0x27b   :  { %v355_v46 = vadd.f32 %v503_v44, %v354_v45 }
 0x27c   :  { %v594_v47 = vpop.f32.mrf.mxu0 }
 0x27d   :  { %v360_v48 = vmax.f32 %v355_v46, 0.0 }
 0x27e   :  { %v357_v49 = vpop.f32.mrf.mxu0 }
 0x27f   :  { %v361_v50 = vpack.c.bf16 %v360_v48, %v360_v48 }
 0x280   :  { %v595_v51 = vpop.f32.mrf.mxu0 }
 0x281   :  { %613 = vmatmul.mubr.bf16.vlgmr.msra.gmra.mxu1 %v361_v50 }
 0x341   :  { %v467_v53 = vpop.f32.mrf.mxu1 }
 0x342   :  { %v468_v54 = vadd.f32 %v512_v52, %v467_v53 }
 0x343   :  { %v614_v55 = vpop.f32.mrf.mxu1 }
 0x344   :  { %474 = vst.msk [vmem:[#allocation8] sm:$0xff] %vm473_vm2, %v468_v54 }
 0x345   :  { %v470_v56 = vpop.f32.mrf.mxu1 }
 0x346   :  { %720 = shalt.err (!%p717_p5)
}
 0x347   :  { %484 = dma.vmem_to_hbm [thread:$0]  %s482_s16, 128, %s907_s9, [#allocation4]   ;;  %v615_v57 = vpop.f32.mrf.mxu1 }
 0x348   :  { %733 = dma.done.wait [#allocation4], 128  }
 0x349   :  { %734 = vsyncadd [#allocation4], 4294967168 }
 0x34a   :  { %488 = vsyncpa [#allocation3], 1 }
 0x34b   :  { %489 = vsyncpa [#allocation6], 1 }
 0x34c   :  { %490 = vsyncpa [#allocation4], 1 }

</bundles_post_ra>
